<compile_context>
chip_gen: v5e
topology: v5e:2x2
jax: 0.10.0
libtpu: 0.0.40
codegen_flags: <defaults>
</compile_context>

<pallas_src>
import functools

import jax
import jax.numpy as jnp
from jax.experimental import pallas as pl
from jax.experimental.pallas import tpu as pltpu

INPUT_SIZE = 3
HIDDEN_SIZE = 60
OUTPUT_SIZE = 2


def decoder_kernel(x_ref, w1t_ref, b1_ref, w2t_ref, b2_ref, o_ref):
    # Native row-major blocks (batch on the sublane axis):
    #   x_ref   : (TB, INPUT_SIZE)
    #   w1t_ref : (INPUT_SIZE, HIDDEN_SIZE)   -- fc1 weight, transposed once in wrapper
    #   b1_ref  : (1, HIDDEN_SIZE)
    #   w2t_ref : (HIDDEN_SIZE, OUTPUT_SIZE)  -- fc2 weight, transposed once in wrapper
    #   b2_ref  : (1, OUTPUT_SIZE)
    #   o_ref   : (TB, OUTPUT_SIZE)
    x = x_ref[...]

    # Layer 1 on the MXU (K=3); bias + ReLU fused on the VPU.
    h = jnp.dot(x, w1t_ref[...], preferred_element_type=jnp.float32)
    h = jnp.maximum(h + b1_ref[...], 0.0)                    # (TB, HIDDEN)

    # Layer 2 on the MXU (K=60), f32 accumulation.
    y = jnp.dot(h, w2t_ref[...], preferred_element_type=jnp.float32)
    o_ref[...] = (y + b2_ref[...]).astype(o_ref.dtype)       # (TB, OUTPUT)


@functools.partial(jax.jit, static_argnames=("tb",))
def decoder_forward(x, w1, b1, w2, b2, *, tb=4096):
    """x: (B, INPUT_SIZE) f32. Weights in PyTorch layout:
       w1 (HIDDEN, INPUT), b1 (HIDDEN,), w2 (OUTPUT, HIDDEN), b2 (OUTPUT,).
       Returns (B, OUTPUT_SIZE) f32 == fc2(relu(fc1(x)))."""
    B = x.shape[0]

    if B <= tb:
        # One block covering the whole (possibly ragged) batch: block dim ==
        # array dim satisfies the layout rule -> no padding, no extra HBM pass.
        tb_eff, num_tiles, Bp = B, 1, B
        xp = x
    else:
        # B > tb: >= 2 grid steps (keeps both v7x TensorCores busy). Pad only
        # the ragged remainder rows, if any.
        tb_eff = tb
        num_tiles = pl.cdiv(B, tb)
        Bp = num_tiles * tb
        xp = jnp.pad(x, ((0, Bp - B), (0, 0))) if Bp != B else x

    # Tiny one-off layout plumbing for the weights (a few hundred elements).
    w1t = w1.T                           # (INPUT, HIDDEN)
    w2t = w2.T                           # (HIDDEN, OUTPUT)
    b1r = b1.reshape(1, HIDDEN_SIZE)
    b2r = b2.reshape(1, OUTPUT_SIZE)

    flops = 2 * Bp * (INPUT_SIZE * HIDDEN_SIZE + HIDDEN_SIZE * OUTPUT_SIZE)
    bytes_accessed = (Bp * (INPUT_SIZE + OUTPUT_SIZE) * 4
                      + 4 * (w1.size + b1.size + w2.size + b2.size))

    out = pl.pallas_call(
        decoder_kernel,
        out_shape=jax.ShapeDtypeStruct((Bp, OUTPUT_SIZE), jnp.float32),
        grid=(num_tiles,),
        in_specs=[
            # x tiles stream over the batch grid (auto double-buffered,
            # contiguous-row DMAs straight from the row-major input).
            pl.BlockSpec((tb_eff, INPUT_SIZE), lambda i: (i, 0)),
            # Weights / biases: constant index_map -> resident in VMEM.
            pl.BlockSpec((INPUT_SIZE, HIDDEN_SIZE), lambda i: (0, 0)),
            pl.BlockSpec((1, HIDDEN_SIZE), lambda i: (0, 0)),
            pl.BlockSpec((HIDDEN_SIZE, OUTPUT_SIZE), lambda i: (0, 0)),
            pl.BlockSpec((1, OUTPUT_SIZE), lambda i: (0, 0)),
        ],
        out_specs=pl.BlockSpec((tb_eff, OUTPUT_SIZE), lambda i: (i, 0)),
        compiler_params=pltpu.CompilerParams(
            dimension_semantics=("parallel",),        # v7x megacore sharing
            vmem_limit_bytes=48 * 1024 * 1024,        # headroom for large tb, fits v7x
        ),
        cost_estimate=pl.CostEstimate(
            flops=flops, transcendentals=0, bytes_accessed=bytes_accessed),
    )(xp, w1t, b1r, w2t, b2r)

    return out[:B] if Bp != B else out


def init_params(key):
    """Deterministic init mimicking PyTorch nn.Linear (uniform +/- 1/sqrt(fan_in)),
    stored in PyTorch-native (out_features, in_features) layout."""
    k1, k2, k3, k4 = jax.random.split(key, 4)
    bound1 = 1.0 / jnp.sqrt(INPUT_SIZE)
    bound2 = 1.0 / jnp.sqrt(HIDDEN_SIZE)
    w1 = jax.random.uniform(k1, (HIDDEN_SIZE, INPUT_SIZE), jnp.float32,
                            minval=-bound1, maxval=bound1)
    b1 = jax.random.uniform(k2, (HIDDEN_SIZE,), jnp.float32,
                            minval=-bound1, maxval=bound1)
    w2 = jax.random.uniform(k3, (OUTPUT_SIZE, HIDDEN_SIZE), jnp.float32,
                            minval=-bound2, maxval=bound2)
    b2 = jax.random.uniform(k4, (OUTPUT_SIZE,), jnp.float32,
                            minval=-bound2, maxval=bound2)
    return w1, b1, w2, b2


def reference_forward(x, w1, b1, w2, b2):
    hp = jax.lax.Precision.HIGHEST
    h = jnp.maximum(jnp.dot(x, w1.T, precision=hp) + b1, 0.0)
    return jnp.dot(h, w2.T, precision=hp) + b2


if __name__ == "__main__":
    key = jax.random.PRNGKey(0)
    kx1, kx2, kx3, kp = jax.random.split(key, 4)
    w1, b1, w2, b2 = init_params(kp)

    # Case 1: multiple grid steps (small tb override), batch divides the tile.
    x1 = jax.random.normal(kx1, (384, INPUT_SIZE), dtype=jnp.float32)
    o1 = jax.block_until_ready(decoder_forward(x1, w1, b1, w2, b2, tb=128))
    r1 = reference_forward(x1, w1, b1, w2, b2)
    assert o1.shape == (384, OUTPUT_SIZE)
    assert jnp.allclose(o1, r1, atol=1e-5, rtol=1e-5), "mismatch (batch=384, tb=128)"

    # Case 2: ragged batch > tile (pad/slice path), 3 grid steps.
    x2 = jax.random.normal(kx2, (300, INPUT_SIZE), dtype=jnp.float32)
    o2 = jax.block_until_ready(decoder_forward(x2, w1, b1, w2, b2, tb=128))
    r2 = reference_forward(x2, w1, b1, w2, b2)
    assert o2.shape == (300, OUTPUT_SIZE)
    assert jnp.allclose(o2, r2, atol=1e-5, rtol=1e-5), "mismatch (batch=300, tb=128)"

    # Case 3: tiny batch, single full-array block with the default large tile.
    x3 = jax.random.normal(kx3, (8, INPUT_SIZE), dtype=jnp.float32)
    o3 = jax.block_until_ready(decoder_forward(x3, w1, b1, w2, b2))
    r3 = reference_forward(x3, w1, b1, w2, b2)
    assert o3.shape == (8, OUTPUT_SIZE)
    assert jnp.allclose(o3, r3, atol=1e-5, rtol=1e-5), "mismatch (batch=8)"

    print("KERNEL_OK")
</pallas_src>

<mosaic_0001>
module attributes {stable_mosaic.version = 11 : i64} {
  func.func @decoder_kernel(%arg0: i32, %arg1: memref<128x3xf32, #tpu.memory_space<vmem>>, %arg2: memref<3x60xf32, #tpu.memory_space<vmem>>, %arg3: memref<1x60xf32, #tpu.memory_space<vmem>>, %arg4: memref<60x2xf32, #tpu.memory_space<vmem>>, %arg5: memref<1x2xf32, #tpu.memory_space<vmem>>, %arg6: memref<128x2xf32, #tpu.memory_space<vmem>>) attributes {dimension_semantics = [#tpu.dimension_semantics<parallel>], iteration_bounds = array<i64: 3>, scalar_prefetch = 0 : i64, scratch_operands = 0 : i64, tpu.core_type = #tpu.core_type<tc>, window_params = [{transform_indices = @transform_0, window_bounds = array<i64: 128, 3>}, {pipeline_mode = #tpu.pipeline_mode<synchronous>, transform_indices = @transform_1, window_bounds = array<i64: 3, 60>}, {pipeline_mode = #tpu.pipeline_mode<synchronous>, transform_indices = @transform_2, window_bounds = array<i64: 1, 60>}, {pipeline_mode = #tpu.pipeline_mode<synchronous>, transform_indices = @transform_3, window_bounds = array<i64: 60, 2>}, {pipeline_mode = #tpu.pipeline_mode<synchronous>, transform_indices = @transform_4, window_bounds = array<i64: 1, 2>}, {transform_indices = @transform_5, window_bounds = array<i64: 128, 2>}]} {
    %c0 = arith.constant 0 : index
    %c0_0 = arith.constant 0 : index
    %0 = vector.load %arg1[%c0, %c0_0] : memref<128x3xf32, #tpu.memory_space<vmem>>, vector<128x3xf32>
    %c0_1 = arith.constant 0 : index
    %c0_2 = arith.constant 0 : index
    %1 = vector.load %arg2[%c0_1, %c0_2] : memref<3x60xf32, #tpu.memory_space<vmem>>, vector<3x60xf32>
    %cst = arith.constant dense<0.000000e+00> : vector<128x60xf32>
    %2 = tpu.matmul %0, %1, %cst {dimension_numbers = #tpu.dot_dimension_numbers<[1], [0], [0], [1], [0, 0, 1, 1], [], []>} : vector<128x3xf32>, vector<3x60xf32>, vector<128x60xf32> -> vector<128x60xf32>
    %c0_3 = arith.constant 0 : index
    %c0_4 = arith.constant 0 : index
    %3 = vector.load %arg3[%c0_3, %c0_4] : memref<1x60xf32, #tpu.memory_space<vmem>>, vector<1x60xf32>
    %4 = vector.broadcast %3 : vector<1x60xf32> to vector<128x60xf32>
    %5 = arith.addf %2, %4 : vector<128x60xf32>
    %cst_5 = arith.constant 0.000000e+00 : f32
    %6 = vector.broadcast %cst_5 : f32 to vector<128x60xf32>
    %7 = arith.maximumf %5, %6 : vector<128x60xf32>
    %c0_6 = arith.constant 0 : index
    %c0_7 = arith.constant 0 : index
    %8 = vector.load %arg4[%c0_6, %c0_7] : memref<60x2xf32, #tpu.memory_space<vmem>>, vector<60x2xf32>
    %cst_8 = arith.constant dense<0.000000e+00> : vector<128x2xf32>
    %9 = tpu.matmul %7, %8, %cst_8 {dimension_numbers = #tpu.dot_dimension_numbers<[1], [0], [0], [1], [0, 0, 1, 1], [], []>} : vector<128x60xf32>, vector<60x2xf32>, vector<128x2xf32> -> vector<128x2xf32>
    %c0_9 = arith.constant 0 : index
    %c0_10 = arith.constant 0 : index
    %10 = vector.load %arg5[%c0_9, %c0_10] : memref<1x2xf32, #tpu.memory_space<vmem>>, vector<1x2xf32>
    %11 = vector.broadcast %10 : vector<1x2xf32> to vector<128x2xf32>
    %12 = arith.addf %9, %11 : vector<128x2xf32>
    %c0_11 = arith.constant 0 : index
    %c0_12 = arith.constant 0 : index
    %13 = vector.load %arg6[%c0_11, %c0_12] : memref<128x2xf32, #tpu.memory_space<vmem>>, vector<128x2xf32>
    tpu.vector_store %arg6[%c0_11, %c0_12], %12 {strides = array<i32>} : memref<128x2xf32, #tpu.memory_space<vmem>>, vector<128x2xf32>,
    return
  }
  func.func @transform_0(%arg0: i32) -> (i32, i32) {
    %c0_i32 = arith.constant 0 : i32
    %c0_i32_0 = arith.constant 0 : i32
    return %arg0, %c0_i32 : i32, i32
  }
  func.func @transform_1(%arg0: i32) -> (i32, i32) {
    %c0_i32 = arith.constant 0 : i32
    %c0_i32_0 = arith.constant 0 : i32
    %c0_i32_1 = arith.constant 0 : i32
    return %c0_i32, %c0_i32_0 : i32, i32
  }
  func.func @transform_2(%arg0: i32) -> (i32, i32) {
    %c0_i32 = arith.constant 0 : i32
    %c0_i32_0 = arith.constant 0 : i32
    %c0_i32_1 = arith.constant 0 : i32
    return %c0_i32, %c0_i32_0 : i32, i32
  }
  func.func @transform_3(%arg0: i32) -> (i32, i32) {
    %c0_i32 = arith.constant 0 : i32
    %c0_i32_0 = arith.constant 0 : i32
    %c0_i32_1 = arith.constant 0 : i32
    return %c0_i32, %c0_i32_0 : i32, i32
  }
  func.func @transform_4(%arg0: i32) -> (i32, i32) {
    %c0_i32 = arith.constant 0 : i32
    %c0_i32_0 = arith.constant 0 : i32
    %c0_i32_1 = arith.constant 0 : i32
    return %c0_i32, %c0_i32_0 : i32, i32
  }
  func.func @transform_5(%arg0: i32) -> (i32, i32) {
    %c0_i32 = arith.constant 0 : i32
    %c0_i32_0 = arith.constant 0 : i32
    return %arg0, %c0_i32 : i32, i32
  }
}

</mosaic_0001>

<bundles_post_ra>
// kernel: decoder_forward.1
= control target key start
LH: loop header
LB: loop body
LE: loop exit
PB: predicated region body
PF: predicated region fallthrough
CT: control target
= control target key end

     0   :  { %s696_s18 = smov 0   ;;  %s855_s0 = inlined_call_operand.vmem [shape: f32[384,3], index: 0, kind: input, shape index: {}]   ;;  %s856_s1 = inlined_call_operand.vmem [shape: f32[3,60], index: 1, kind: input, shape index: {}]   ;;  %s857_s2 = inlined_call_operand.vmem [shape: f32[1,60], index: 2, kind: input, shape index: {}]   ;;  %s858_s3 = inlined_call_operand.vmem [shape: f32[60,2], index: 3, kind: input, shape index: {}]   ;;  %s859_s4 = inlined_call_operand.vmem [shape: f32[1,2], index: 4, kind: input, shape index: {}]   ;;  %s860_s5 = inlined_call_operand.vmem [shape: f32[384,2], index: 5, kind: output, shape index: {}]  }
   0x1 LB: > { %s586_s19 = sadd.s32 4294967295, %s664_s18   ;;  %p590_p0 = scmp.ge.s32.totalorder %s664_s18, 1  ;;  %s664_s18 = sphi %s696_s18, %s15_s18  }
   0x2   : > { %p188_p1 = scmp.lt.s32.totalorder %s664_s18, 4 }
   0x4   : > { %p189_p2 = pnand %p590_p0, %p188_p1 }
   0x5   : > { %s591_s22 = sshll.u32 (!%p189_p2), %s586_s19, 4 }
   0x6   : > { %192 = sbr.rel (%p189_p2) target bundleno = 392 (0x188), region = 40  ;;  %p217_p3 = scmp.lt.s32.totalorder (!%p189_p2), %s591_s22, 47 }
   0xb   : > { %v244_v0 = vld [vmem:[%s856_s1] sm:$0x7]  ;;  %vm298_vm0 = vcmask 1042432   ;;  %s862_s22 = smov (!%p217_p3, %s591_s22), 47  ;;  %vm249_vm1 = vcmask 23552   ;;  %vm444_vm2 = vcmask 1043456  }
   0xc   : > { %595 = vmatpush.msk.msra.mxu0 %vm298_vm0, %v244_v0  ;;  %631 = vmatpush.msk.msra.mxu3 %vm298_vm0, %v244_v0  ;;  %s592_s23 = sshll.u32 %s862_s22, 3  ;;  %v390_v10 = vld [vmem:[%s858_s3 + $0x38] sm:$0xf]  ;;  %v389_v11 = vld [vmem:[%s858_s3 + $0x30] sm:$0xff]  ;;  %v388_v12 = vld [vmem:[%s858_s3 + $0x28] sm:$0xff]  ;;  %vm395_vm3 = vcmask 490496  }
   0xd   : > { %s715_s26 = scalar_lea.vmem %s855_s0, %s592_s23  ;;  %612 = vmatpush.msk.msra.mxu1 %vm444_vm2, %v390_v10  ;;  %632 = vmatpush.msk.msra.mxu2 %vm444_vm2, %v390_v10  ;;  %v387_v14 = vld [vmem:[%s858_s3 + $0x20] sm:$0xff]  ;;  %v386_v16 = vld [vmem:[%s858_s3 + $0x18] sm:$0xff]  ;;  %v385_v22 = vld [vmem:[%s858_s3 + $0x10] sm:$0xff]  ;;  %s818_s27 = scalar_lea.vmem %s860_s5, %s592_s23  ;;  %vm513_vm4 = vcmask 15360  }
   0xe   : > { %v228_v1 = vld [vmem:[%s715_s26] sm:$0xff]  ;;  %v229_v2 = vld [vmem:[%s715_s26 + $0x8] sm:$0xff]  ;;  %v230_v3 = vld [vmem:[%s715_s26 + $0x10] sm:$0xff]  ;;  %633 = vmatpush.msk.msrb.mxu3 %vm444_vm2, %v390_v10 }
   0xf   : > { %596 = vmatmul.msk.f32.vlgmr.msra.gmra.mxu0 %vm249_vm1, %v228_v1  ;;  %v231_v4 = vld [vmem:[%s715_s26 + $0x18] sm:$0xff]  ;;  %v237_v5 = vld [vmem:[%s715_s26 + $0x48] sm:$0xff]  ;;  %v232_v6 = vld [vmem:[%s715_s26 + $0x20] sm:$0xff]  ;;  %457 = vmatpush.msra.mxu1 %v389_v11 }
  0x10   : > { %605 = vmatmul.msk.f32.vlgmr.msra.gmra.mxu3 %vm249_vm1, %v237_v5  ;;  %v238_v7 = vld [vmem:[%s715_s26 + $0x50] sm:$0xff]  ;;  %v233_v8 = vld [vmem:[%s715_s26 + $0x28] sm:$0xff]  ;;  %v239_v9 = vld [vmem:[%s715_s26 + $0x58] sm:$0xff]  ;;  %634 = vmatpush.msra.mxu2 %v389_v11 }
  0x11   : > { %v234_v13 = vld [vmem:[%s715_s26 + $0x30] sm:$0xff]  ;;  %635 = vmatpush.msrb.mxu3 %v389_v11  ;;  %v240_v15 = vld [vmem:[%s715_s26 + $0x60] sm:$0xff]  ;;  %458 = vmatpush.msra.mxu1 %v388_v12  ;;  %v235_v17 = vld [vmem:[%s715_s26 + $0x38] sm:$0xff] }
  0x12   : > { %636 = vmatpush.msra.mxu2 %v388_v12  ;;  %v241_v18 = vld [vmem:[%s715_s26 + $0x68] sm:$0xff]  ;;  %v236_v19 = vld [vmem:[%s715_s26 + $0x40] sm:$0xff]  ;;  %v242_v20 = vld [vmem:[%s715_s26 + $0x70] sm:$0xff] }
  0x13   : > { %637 = vmatpush.msrb.mxu3 %v388_v12  ;;  %459 = vmatpush.msra.mxu1 %v387_v14  ;;  %v243_v21 = vld [vmem:[%s715_s26 + $0x78] sm:$0xff]  ;;  %v384_v23 = vld [vmem:[%s858_s3 + $0x8] sm:$0xff]  ;;  %v383_v24 = vld [vmem:[%s858_s3] sm:$0xff] }
  0x14   : > { %638 = vmatpush.msra.mxu2 %v387_v14  ;;  %v776_v25 = vld [vmem:[%s857_s2] ss:$0 sm:$0xff] }
  0x15   : > { %460 = vmatpush.msra.mxu1 %v386_v16  ;;  %639 = vmatpush.msrb.mxu3 %v387_v14  ;;  %v657_v10 = vld [vmem:[%s859_s4] ss:$0 sm:$0xff] }
  0x16   : > { %640 = vmatpush.msra.mxu2 %v386_v16 }
  0x17   : > { %597 = vmatmul.msk.f32.gmra.mxu0 %vm249_vm1, %v229_v2  ;;  %641 = vmatpush.msrb.mxu3 %v386_v16 }
  0x18   : > { %606 = vmatmul.msk.f32.gmra.mxu3 %vm249_vm1, %v238_v7  ;;  %461 = vmatpush.msra.mxu1 %v385_v22 }
  0x19   : > { %642 = vmatpush.msra.mxu2 %v385_v22  ;;  %643 = vmatpush.msrb.mxu3 %v385_v22 }
  0x1a   : > { %462 = vmatpush.msra.mxu1 %v384_v23 }
  0x1b   : > { %644 = vmatpush.msra.mxu2 %v384_v23  ;;  %645 = vmatpush.msrb.mxu3 %v384_v23 }
  0x1c   : > { %463 = vmatpush.msra.mxu1 %v383_v24 }
  0x1d   : > { %646 = vmatpush.msra.mxu2 %v383_v24  ;;  %647 = vmatpush.msrb.mxu3 %v383_v24 }
  0x1f   : > { %598 = vmatmul.msk.f32.gmra.mxu0 %vm249_vm1, %v230_v3 }
  0x20   : > { %607 = vmatmul.msk.f32.gmra.mxu3 %vm249_vm1, %v239_v9 }
  0x27   : > { %599 = vmatmul.msk.f32.gmra.mxu0 %vm249_vm1, %v231_v4 }
  0x28   : > { %608 = vmatmul.msk.f32.gmra.mxu3 %vm249_vm1, %v240_v15 }
  0x2f   : > { %600 = vmatmul.msk.f32.gmra.mxu0 %vm249_vm1, %v232_v6 }
  0x30   : > { %609 = vmatmul.msk.f32.gmra.mxu3 %vm249_vm1, %v241_v18 }
  0x37   : > { %601 = vmatmul.msk.f32.gmra.mxu0 %vm249_vm1, %v233_v8 }
  0x38   : > { %610 = vmatmul.msk.f32.gmra.mxu3 %vm249_vm1, %v242_v20 }
  0x3f   : > { %602 = vmatmul.msk.f32.gmra.mxu0 %vm249_vm1, %v234_v13 }
  0x40   : > { %611 = vmatmul.msk.f32.gmra.mxu3 %vm249_vm1, %v243_v21 }
  0x47   : > { %603 = vmatmul.msk.f32.gmra.mxu0 %vm249_vm1, %v235_v17 }
  0x4f   : > { %604 = vmatmul.msk.f32.gmra.mxu0 %vm249_vm1, %v236_v19 }
  0x8c   : > { %v319_v26 = vpop.f32.mrf.mxu0 }
  0x8d   : > { %v320_v27 = vadd.f32 %v776_v25, %v319_v26 }
  0x8f   : > { %v367_v28 = vmax.f32 %v320_v27, 0.0 }
  0x91   : > { %613 = vmatmul.msk.f32.vlgmr.msra.gmra.mxu1 %vm395_vm3, %v367_v28 }
  0x93   : > { %v346_v39 = vpop.f32.mrf.mxu3 }
  0x94   : > { %v322_v29 = vpop.f32.mrf.mxu0  ;;  %v347_v58 = vadd.f32 %v776_v25, %v346_v39 }
  0x95   : > { %v323_v30 = vadd.f32 %v776_v25, %v322_v29 }
  0x96   : > { %v376_v60 = vmax.f32 %v347_v58, 0.0 }
  0x97   : > { %v368_v31 = vmax.f32 %v323_v30, 0.0 }
  0x99   : > { %614 = vmatmul.msk.f32.gmra.mxu1 %vm395_vm3, %v368_v31 }
  0x9b   : > { %v349_v43 = vpop.f32.mrf.mxu3 }
  0x9c   : > { %v325_v32 = vpop.f32.mrf.mxu0  ;;  %v350_v61 = vadd.f32 %v776_v25, %v349_v43 }
  0x9d   : > { %v326_v33 = vadd.f32 %v776_v25, %v325_v32 }
  0x9e   : > { %v377_v0 = vmax.f32 %v350_v61, 0.0 }
  0x9f   : > { %v369_v34 = vmax.f32 %v326_v33, 0.0 }
  0xa1   : > { %615 = vmatmul.msk.f32.gmra.mxu1 %vm395_vm3, %v369_v34 }
  0xa3   : > { %v352_v47 = vpop.f32.mrf.mxu3 }
  0xa4   : > { %v328_v35 = vpop.f32.mrf.mxu0  ;;  %v353_v2 = vadd.f32 %v776_v25, %v352_v47 }
  0xa5   : > { %v329_v36 = vadd.f32 %v776_v25, %v328_v35 }
  0xa6   : > { %v378_v3 = vmax.f32 %v353_v2, 0.0 }
  0xa7   : > { %v370_v37 = vmax.f32 %v329_v36, 0.0 }
  0xa9   : > { %616 = vmatmul.msk.f32.gmra.mxu1 %vm395_vm3, %v370_v37 }
  0xab   : > { %v355_v51 = vpop.f32.mrf.mxu3 }
  0xac   : > { %v331_v38 = vpop.f32.mrf.mxu0  ;;  %v356_v4 = vadd.f32 %v776_v25, %v355_v51 }
  0xad   : > { %v332_v40 = vadd.f32 %v776_v25, %v331_v38 }
  0xae   : > { %v379_v5 = vmax.f32 %v356_v4, 0.0 }
  0xaf   : > { %v371_v41 = vmax.f32 %v332_v40, 0.0 }
  0xb1   : > { %617 = vmatmul.msk.f32.gmra.mxu1 %vm395_vm3, %v371_v41 }
  0xb3   : > { %v358_v55 = vpop.f32.mrf.mxu3 }
  0xb4   : > { %v334_v42 = vpop.f32.mrf.mxu0  ;;  %v359_v6 = vadd.f32 %v776_v25, %v358_v55 }
  0xb5   : > { %v335_v44 = vadd.f32 %v776_v25, %v334_v42 }
  0xb6   : > { %v380_v7 = vmax.f32 %v359_v6, 0.0 }
  0xb7   : > { %v372_v45 = vmax.f32 %v335_v44, 0.0 }
  0xb9   : > { %618 = vmatmul.msk.f32.gmra.mxu1 %vm395_vm3, %v372_v45 }
  0xbb   : > { %v361_v59 = vpop.f32.mrf.mxu3 }
  0xbc   : > { %v337_v46 = vpop.f32.mrf.mxu0  ;;  %v362_v8 = vadd.f32 %v776_v25, %v361_v59 }
  0xbd   : > { %v338_v48 = vadd.f32 %v776_v25, %v337_v46 }
  0xbe   : > { %v381_v9 = vmax.f32 %v362_v8, 0.0 }
  0xbf   : > { %v373_v49 = vmax.f32 %v338_v48, 0.0 }
  0xc1   : > { %619 = vmatmul.msk.f32.gmra.mxu1 %vm395_vm3, %v373_v49 }
  0xc3   : > { %v364_v62 = vpop.f32.mrf.mxu3 }
  0xc4   : > { %v340_v50 = vpop.f32.mrf.mxu0  ;;  %v365_v63 = vadd.f32 %v776_v25, %v364_v62 }
  0xc5   : > { %v341_v52 = vadd.f32 %v776_v25, %v340_v50 }
  0xc6   : > { %v382_v1 = vmax.f32 %v365_v63, 0.0 }
  0xc7   : > { %v374_v53 = vmax.f32 %v341_v52, 0.0 }
  0xc8   : > { %628 = vmatmul.msk.f32.vlgmr.msrb.gmra.mxu3 %vm395_vm3, %v382_v1 }
  0xc9   : > { %620 = vmatmul.msk.f32.vlgmr.msra.gmra.mxu2 %vm395_vm3, %v374_v53 }
  0xcc   : > { %v343_v54 = vpop.f32.mrf.mxu0 }
  0xcd   : > { %v344_v56 = vadd.f32 %v776_v25, %v343_v54 }
  0xcf   : > { %v375_v57 = vmax.f32 %v344_v56, 0.0 }
  0xd1   : > { %621 = vmatmul.msk.f32.gmra.mxu2 %vm395_vm3, %v375_v57 }
  0xd9   : > { %622 = vmatmul.msk.f32.gmra.mxu2 %vm395_vm3, %v376_v60 }
  0xe1   : > { %623 = vmatmul.msk.f32.gmra.mxu2 %vm395_vm3, %v377_v0 }
  0xe9   : > { %624 = vmatmul.msk.f32.gmra.mxu2 %vm395_vm3, %v378_v3 }
  0xf1   : > { %625 = vmatmul.msk.f32.gmra.mxu2 %vm395_vm3, %v379_v5 }
  0xf9   : > { %626 = vmatmul.msk.f32.gmra.mxu2 %vm395_vm3, %v380_v7 }
 0x101   : > { %627 = vmatmul.msk.f32.gmra.mxu2 %vm395_vm3, %v381_v9 }
 0x10e   : > { %v465_v11 = vpop.f32.mrf.mxu1 }
 0x10f   : > { %v466_v12 = vadd.f32 %v657_v10, %v465_v11 }
 0x111   : > { %514 = vst.msk [vmem:[%s818_s27] sm:$0xff] %vm513_vm4, %v466_v12 }
 0x116   : > { %v468_v13 = vpop.f32.mrf.mxu1 }
 0x117   : > { %v469_v14 = vadd.f32 %v657_v10, %v468_v13 }
 0x119   : > { %515 = vst.msk [vmem:[%s818_s27 + $0x8] sm:$0xff] %vm513_vm4, %v469_v14 }
 0x11e   : > { %v471_v15 = vpop.f32.mrf.mxu1 }
 0x11f   : > { %v472_v16 = vadd.f32 %v657_v10, %v471_v15 }
 0x121   : > { %516 = vst.msk [vmem:[%s818_s27 + $0x10] sm:$0xff] %vm513_vm4, %v472_v16 }
 0x126   : > { %v474_v17 = vpop.f32.mrf.mxu1 }
 0x127   : > { %v475_v18 = vadd.f32 %v657_v10, %v474_v17 }
 0x129   : > { %517 = vst.msk [vmem:[%s818_s27 + $0x18] sm:$0xff] %vm513_vm4, %v475_v18 }
 0x12e   : > { %v477_v19 = vpop.f32.mrf.mxu1 }
 0x12f   : > { %v478_v20 = vadd.f32 %v657_v10, %v477_v19 }
 0x131   : > { %518 = vst.msk [vmem:[%s818_s27 + $0x20] sm:$0xff] %vm513_vm4, %v478_v20 }
 0x136   : > { %v480_v21 = vpop.f32.mrf.mxu1 }
 0x137   : > { %v481_v22 = vadd.f32 %v657_v10, %v480_v21 }
 0x139   : > { %519 = vst.msk [vmem:[%s818_s27 + $0x28] sm:$0xff] %vm513_vm4, %v481_v22 }
 0x13e   : > { %v483_v23 = vpop.f32.mrf.mxu1 }
 0x13f   : > { %v484_v24 = vadd.f32 %v657_v10, %v483_v23 }
 0x141   : > { %520 = vst.msk [vmem:[%s818_s27 + $0x30] sm:$0xff] %vm513_vm4, %v484_v24 }
 0x14b   : > { %v510_v32 = vpop.f32.mrf.mxu3 }
 0x14c   : > { %v486_v25 = vpop.f32.mrf.mxu2  ;;  %v511_v34 = vadd.f32 %v657_v10, %v510_v32 }
 0x14d   : > { %v487_v26 = vadd.f32 %v657_v10, %v486_v25 }
 0x14e   : > { %529 = vst.msk [vmem:[%s818_s27 + $0x78] sm:$0xff] %vm513_vm4, %v511_v34 }
 0x14f   : > { %521 = vst.msk [vmem:[%s818_s27 + $0x38] sm:$0xff] %vm513_vm4, %v487_v26 }
 0x154   : > { %v489_v27 = vpop.f32.mrf.mxu2 }
 0x155   : > { %v490_v28 = vadd.f32 %v657_v10, %v489_v27 }
 0x157   : > { %522 = vst.msk [vmem:[%s818_s27 + $0x40] sm:$0xff] %vm513_vm4, %v490_v28 }
 0x15c   : > { %v492_v29 = vpop.f32.mrf.mxu2 }
 0x15d   : > { %v493_v30 = vadd.f32 %v657_v10, %v492_v29 }
 0x15f   : > { %523 = vst.msk [vmem:[%s818_s27 + $0x48] sm:$0xff] %vm513_vm4, %v493_v30 }
 0x164   : > { %v495_v31 = vpop.f32.mrf.mxu2 }
 0x165   : > { %v496_v33 = vadd.f32 %v657_v10, %v495_v31 }
 0x167   : > { %524 = vst.msk [vmem:[%s818_s27 + $0x50] sm:$0xff] %vm513_vm4, %v496_v33 }
 0x16c   : > { %v498_v35 = vpop.f32.mrf.mxu2 }
 0x16d   : > { %v499_v36 = vadd.f32 %v657_v10, %v498_v35 }
 0x16f   : > { %525 = vst.msk [vmem:[%s818_s27 + $0x58] sm:$0xff] %vm513_vm4, %v499_v36 }
 0x174   : > { %v501_v37 = vpop.f32.mrf.mxu2 }
 0x175   : > { %v502_v38 = vadd.f32 %v657_v10, %v501_v37 }
 0x177   : > { %526 = vst.msk [vmem:[%s818_s27 + $0x60] sm:$0xff] %vm513_vm4, %v502_v38 }
 0x17c   : > { %v504_v39 = vpop.f32.mrf.mxu2 }
 0x17d   : > { %v505_v40 = vadd.f32 %v657_v10, %v504_v39 }
 0x17f   : > { %527 = vst.msk [vmem:[%s818_s27 + $0x68] sm:$0xff] %vm513_vm4, %v505_v40 }
 0x184   : > { %v507_v41 = vpop.f32.mrf.mxu2 }
 0x185   : > { %v508_v42 = vadd.f32 %v657_v10, %v507_v41 }
 0x187   : > { %528 = vst.msk [vmem:[%s818_s27 + $0x70] sm:$0xff] %vm513_vm4, %v508_v42 }
 0x188 PF: > { %s15_s18 = sadd.s32 1, %s664_s18  }
 0x189   : > { %p12_p4 = scmp.ge.s32.totalorder %s15_s18, 5  }
 0x18b   :  { %14 = sbr.rel (!%p12_p4) target bundleno = 1 (0x1), region = 70 }

</bundles_post_ra>
